<compile_context>
chip_gen: v7x
topology: tpu7x:2x2x1
jax: 0.10.0
libtpu: 0.0.40
codegen_flags: <defaults>
</compile_context>

<pallas_src>
import functools

import jax
import jax.numpy as jnp
from jax.experimental import pallas as pl
from jax.experimental.pallas import tpu as pltpu


def _round_up(x, m):
    return ((x + m - 1) // m) * m


def _flatten_head_kernel(x_ref, w_ref, b_ref, o_ref):
    # X:[TM, nf] (bf16) @ W:[nf, TN] (bf16) -> f32 accumulation on the MXU.
    acc = jnp.dot(x_ref[...], w_ref[...], preferred_element_type=jnp.float32)
    acc = acc + b_ref[...]              # [1, TN] f32, broadcast over rows
    # Dropout with p=0 / eval mode is the identity -> nothing to do.
    o_ref[...] = acc.astype(o_ref.dtype)


def prepare_flatten_head_params(weight, bias, *, param_dtype=jnp.bfloat16):
    """One-time Linear-parameter prep: W -> [nf, Tp] (padded, bf16), b -> [1, Tp] f32.

    weight: [target_window, nf], bias: [target_window].  Call once at init, not per step.
    """
    target_window, nf = weight.shape
    assert bias.shape == (target_window,)
    Tp = _round_up(target_window, 128)          # lane-dense output width
    wt = weight.T.astype(param_dtype)           # [nf, target_window]
    b_f32 = bias.astype(jnp.float32)
    if Tp != target_window:
        wt = jnp.pad(wt, ((0, 0), (0, Tp - target_window)))
        b_f32 = jnp.pad(b_f32, (0, Tp - target_window))
    return wt, b_f32.reshape(1, Tp)


@functools.partial(jax.jit, static_argnames=("target_window", "max_tm"))
def flatten_head_forward(x, wt, b2d, *, target_window, max_tm=512):
    """x: [B, n_vars, d_model, patch_num]; wt: [nf, Tp] (prepared); b2d: [1, Tp]."""
    B, n_vars, d_model, patch_num = x.shape
    nf = d_model * patch_num
    nf_w, Tp = wt.shape
    assert nf_w == nf, "prepared weight inner dim must equal d_model*patch_num"
    assert Tp % 128 == 0 and Tp >= target_window

    # Flatten last two dims (matches torch Flatten(start_dim=-2), row-major) and
    # cast the (small) activation slab to the matmul dtype (no-op if already bf16).
    M = B * n_vars
    x2d = x.reshape(M, nf).astype(wt.dtype)

    # --- M tiling: keep X resident when small (the common PatchTST case) -------
    if M <= max_tm:
        TM, Mp, grid_m = M, M, 1                # block == full dim: no pad copy of X
    else:
        TM = max_tm                             # multiple of 8 (and of 128)
        Mp = _round_up(M, TM)
        if Mp != M:                             # only pads for large, ragged M
            x2d = jnp.pad(x2d, ((0, Mp - M), (0, 0)))
        grid_m = Mp // TM

    # --- N tiling: stream the dominant weight in lane-dense blocks -------------
    TN = 256 if Tp % 256 == 0 else 128
    grid_n = Tp // TN

    out_dtype = x.dtype
    out_itemsize = jnp.dtype(out_dtype).itemsize
    in_itemsize = jnp.dtype(wt.dtype).itemsize

    # Explicit VMEM budget (double-buffered tiles), clamped v7x-safe (<< 64 MiB/TC).
    vmem_need = (2 * TM * nf * in_itemsize      # X blocks (resident when grid_m == 1)
                 + 2 * nf * TN * in_itemsize    # streamed W blocks
                 + 2 * TN * 4                   # bias blocks
                 + 2 * TM * TN * out_itemsize)  # output blocks
    vmem_limit = int(min(max(2 * vmem_need, 8 << 20), 48 << 20))

    cost = pl.CostEstimate(
        flops=2 * Mp * nf * Tp,
        transcendentals=0,
        bytes_accessed=(Mp * nf * in_itemsize
                        + grid_m * nf * Tp * in_itemsize
                        + Mp * Tp * out_itemsize),
    )

    out2d = pl.pallas_call(
        _flatten_head_kernel,
        out_shape=jax.ShapeDtypeStruct((Mp, Tp), out_dtype),
        grid_spec=pltpu.PrefetchScalarGridSpec(
            num_scalar_prefetch=0,
            grid=(grid_m, grid_n),              # j (target_window) is the fast axis
            in_specs=[
                # X: constant across j -> loaded once per M tile, stays in VMEM.
                pl.BlockSpec((TM, nf), lambda i, j: (i, 0)),
                # W: streamed (nf, TN) blocks, double-buffered -> DMA overlaps MXU.
                # TODO(synk): if the W DMA is still exposed (tiny per-tile compute),
                # sweep pipeline_mode=pl.Buffered(3) here; VMEM budget allows it.
                pl.BlockSpec((nf, TN), lambda i, j: (0, j)),
                pl.BlockSpec((1, TN), lambda i, j: (0, j)),
            ],
            out_specs=pl.BlockSpec((TM, TN), lambda i, j: (i, j)),
        ),
        compiler_params=pltpu.CompilerParams(
            dimension_semantics=("parallel", "parallel"),  # megacore sharding on v7x
            vmem_limit_bytes=vmem_limit,
        ),
        cost_estimate=cost,
    )(x2d, wt, b2d)

    # Slice off padding and restore [B, n_vars, target_window].
    # Note: output dtype follows x.dtype (bf16 in -> bf16 out), unlike a PyTorch
    # f32 Linear; cast outside if f32 outputs are required.
    return out2d[:M, :target_window].reshape(B, n_vars, target_window)


if __name__ == "__main__":
    # Small shapes consistent with PatchTST's FlattenHead.
    B, n_vars, d_model, patch_num = 2, 4, 16, 8
    nf = d_model * patch_num          # 128
    target_window = 32

    key = jax.random.PRNGKey(0)
    kx, kw, kb = jax.random.split(key, 3)

    x = jax.random.normal(kx, (B, n_vars, d_model, patch_num), dtype=jnp.float32)
    # Deterministic synthetic parameters (Linear(nf, target_window)).
    weight = jax.random.normal(kw, (target_window, nf), dtype=jnp.float32) * 0.02
    bias = jax.random.normal(kb, (target_window,), dtype=jnp.float32) * 0.02

    # One-time parameter prep (transpose + pad + bf16 cast), then the hot call.
    wt, b2d = prepare_flatten_head_params(weight, bias)
    out = flatten_head_forward(x, wt, b2d, target_window=target_window)
    out = jax.block_until_ready(out)

    # Reference with identical bf16 operand rounding and f32 accumulation.
    x_bf = x.reshape(B * n_vars, nf).astype(jnp.bfloat16).astype(jnp.float32)
    w_bf = weight.astype(jnp.bfloat16).astype(jnp.float32)
    ref = (x_bf @ w_bf.T + bias).reshape(B, n_vars, target_window)

    assert out.shape == (B, n_vars, target_window)
    assert out.dtype == x.dtype
    assert jnp.allclose(out.astype(jnp.float32), ref, atol=1e-3, rtol=1e-3)

    print("KERNEL_OK")
</pallas_src>

<mosaic_0001>
module attributes {stable_mosaic.version = 11 : i64} {
  func.func @_flatten_head_kernel(%arg0: i32, %arg1: i32, %arg2: memref<8x128xbf16, #tpu.memory_space<vmem>>, %arg3: memref<128x128xbf16, #tpu.memory_space<vmem>>, %arg4: memref<1x128xf32, #tpu.memory_space<vmem>>, %arg5: memref<8x128xf32, #tpu.memory_space<vmem>>) attributes {dimension_semantics = [#tpu.dimension_semantics<parallel>, #tpu.dimension_semantics<parallel>], iteration_bounds = array<i64: 1, 1>, scalar_prefetch = 0 : i64, scratch_operands = 0 : i64, tpu.core_type = #tpu.core_type<tc>, window_params = [{transform_indices = @transform_0, window_bounds = array<i64: 8, 128>}, {transform_indices = @transform_1, window_bounds = array<i64: 128, 128>}, {transform_indices = @transform_2, window_bounds = array<i64: 1, 128>}, {transform_indices = @transform_3, window_bounds = array<i64: 8, 128>}]} {
    %c0 = arith.constant 0 : index
    %c0_0 = arith.constant 0 : index
    %0 = vector.load %arg2[%c0, %c0_0] : memref<8x128xbf16, #tpu.memory_space<vmem>>, vector<8x128xbf16>
    %c0_1 = arith.constant 0 : index
    %c0_2 = arith.constant 0 : index
    %1 = vector.load %arg3[%c0_1, %c0_2] : memref<128x128xbf16, #tpu.memory_space<vmem>>, vector<128x128xbf16>
    %cst = arith.constant dense<0.000000e+00> : vector<8x128xf32>
    %2 = tpu.matmul %0, %1, %cst {dimension_numbers = #tpu.dot_dimension_numbers<[1], [0], [0], [1], [0, 0, 1, 1], [], []>} : vector<8x128xbf16>, vector<128x128xbf16>, vector<8x128xf32> -> vector<8x128xf32>
    %c0_3 = arith.constant 0 : index
    %c0_4 = arith.constant 0 : index
    %3 = vector.load %arg4[%c0_3, %c0_4] : memref<1x128xf32, #tpu.memory_space<vmem>>, vector<1x128xf32>
    %4 = vector.broadcast %3 : vector<1x128xf32> to vector<8x128xf32>
    %5 = arith.addf %2, %4 : vector<8x128xf32>
    %c0_5 = arith.constant 0 : index
    %c0_6 = arith.constant 0 : index
    %6 = vector.load %arg5[%c0_5, %c0_6] : memref<8x128xf32, #tpu.memory_space<vmem>>, vector<8x128xf32>
    tpu.vector_store %arg5[%c0_5, %c0_6], %5 {strides = array<i32>} : memref<8x128xf32, #tpu.memory_space<vmem>>, vector<8x128xf32>,
    return
  }
  func.func @transform_0(%arg0: i32, %arg1: i32) -> (i32, i32) {
    %c0_i32 = arith.constant 0 : i32
    %c0_i32_0 = arith.constant 0 : i32
    return %arg0, %c0_i32 : i32, i32
  }
  func.func @transform_1(%arg0: i32, %arg1: i32) -> (i32, i32) {
    %c0_i32 = arith.constant 0 : i32
    %c0_i32_0 = arith.constant 0 : i32
    return %c0_i32, %arg1 : i32, i32
  }
  func.func @transform_2(%arg0: i32, %arg1: i32) -> (i32, i32) {
    %c0_i32 = arith.constant 0 : i32
    %c0_i32_0 = arith.constant 0 : i32
    return %c0_i32, %arg1 : i32, i32
  }
  func.func @transform_3(%arg0: i32, %arg1: i32) -> (i32, i32) {
    %c0_i32 = arith.constant 0 : i32
    return %arg0, %arg1 : i32, i32
  }
}

</mosaic_0001>

<bundles_post_ra>
// kernel: flatten_head_forward.1
= control target key start
LH: loop header
LB: loop body
LE: loop exit
PB: predicated region body
PF: predicated region fallthrough
CT: control target
= control target key end

     0   :  { %v216_v1 = vmov 0.0   ;;  %vm217_vm0 = vmmov 0   ;;  %s281_s0 = inlined_call_operand.vmem [shape: bf16[8,128], index: 0, kind: input, shape index: {}]   ;;  %s282_s1 = inlined_call_operand.vmem [shape: bf16[128,128], index: 1, kind: input, shape index: {}]   ;;  %s283_s2 = inlined_call_operand.vmem [shape: f32[1,128], index: 2, kind: input, shape index: {}]   ;;  %s284_s3 = inlined_call_operand.hbm [shape: f32[8,128], index: 3, kind: output, shape index: {}]  }
   0x1   :  { %v184_v0 = vld [vmem:[%s282_s1] sm:$0xff]   ;;  %161 = vmatprep.subr.bf16.mxu0 %v216_v1  ;;  %v185_v2 = vld [vmem:[%s282_s1 + $0x8] sm:$0xff]   ;;  %177 = vmatprep.mubr.msk.bf16.mxu0 %vm217_vm0, %v216_v1  ;;  %v186_v3 = vld [vmem:[%s282_s1 + $0x10] sm:$0xff]  }
   0x2   :  { %162 = vmatpush3.bf16.msra.mxu0 %v184_v0 }
   0x3   :  { %163 = vmatprep.subr.bf16.mxu0 %v216_v1 }
   0x6   :  { %164 = vmatpush3.bf16.msra.mxu0 %v185_v2 }
   0x7   :  { %165 = vmatprep.subr.bf16.mxu0 %v216_v1 }
   0x8   :  { %8 = vsyncpa [#allocation3], 0  ;;  %v187_v4 = vld [vmem:[%s282_s1 + $0x18] sm:$0xff]   ;;  %v188_v5 = vld [vmem:[%s282_s1 + $0x20] sm:$0xff]   ;;  %s218_s5 = smov [#allocation2]  }
   0x9   :  { %v189_v6 = vld [vmem:[%s282_s1 + $0x28] sm:$0xff]   ;;  %v190_v7 = vld [vmem:[%s282_s1 + $0x30] sm:$0xff]   ;;  %v191_v8 = vld [vmem:[%s282_s1 + $0x38] sm:$0xff]   ;;  %s135_s6 = sshll.u32 %s218_s5, 4  ;;  %s136_s6 = int_to_ptr.vmem [resolvable:$true] %s135_s6 }
   0xa   :  { %166 = vmatpush3.bf16.msra.mxu0 %v186_v3  ;;  %v16_v9 = vld [vmem:[%s281_s0] sm:$0xf]  ;;  %s192_s1 = scalar_lea.vmem %s136_s6, 128  ;;  %p197_p1 = scmp.lt.s32.totalorder %s136_s6, %s136_s6 }
   0xb   :  { %167 = vmatprep.subr.bf16.mxu0 %v216_v1  ;;  %v143_v10 = vld [vmem:[%s283_s2] ss:$0 sm:$0xff]  ;;  %p193_p0 = scmp.ne.s32.totalorder %s136_s6, %s192_s1  ;;  %p198_p2 = scmp.lt.s32.totalorder %s192_s1, %s192_s1 }
   0xd   :  { %p199_p3 = por %p198_p2, %p197_p1 }
   0xe   :  { %168 = vmatpush3.bf16.msra.mxu0 %v187_v4 }
   0xf   :  { %169 = vmatprep.subr.bf16.mxu0 %v216_v1  ;;  %p200_p4 = pnand %p199_p3, %p193_p0 }
  0x12   :  { %170 = vmatpush3.bf16.msra.mxu0 %v188_v5 }
  0x13   :  { %171 = vmatprep.subr.bf16.mxu0 %v216_v1 }
  0x16   :  { %172 = vmatpush3.bf16.msra.mxu0 %v189_v6 }
  0x17   :  { %173 = vmatprep.subr.bf16.mxu0 %v216_v1 }
  0x1a   :  { %174 = vmatpush3.bf16.msra.mxu0 %v190_v7 }
  0x1b   :  { %175 = vmatprep.subr.bf16.mxu0 %v216_v1 }
  0x1e   :  { %176 = vmatpush3.bf16.msra.mxu0 %v191_v8 }
  0x21   :  { %178 = vmatmul.mubr.bf16.vlgmr.msra.gmra.mrb[0].mxu0 %v16_v9 }
  0xf4   :  { %v122_v11 = vpop.f32.mrb[0].mxu0 }
  0xf5   :  { %v123_v12 = vadd.f32 %v143_v10, %v122_v11  ;;  %v179_v13 = vpop.f32.mrb[1].mxu0 }
  0xf6   :  { %v125_v14 = vpop.f32.mrb[2].mxu0 }
  0xf7   :  { %128 = vst [vmem:[#allocation2] sm:$0xff] %v123_v12  ;;  %v180_v15 = vpop.f32.mrb[3].mxu0 }
  0xf8   :  { %203 = shalt.err (!%p200_p4)
}
  0xf9   :  { %s204_s2 = scalar_lea.hbm %s284_s3, 128 }
  0xfa   :  { %p205_p5 = scmp.ne.s32.totalorder %s284_s3, %s204_s2  ;;  %p208_p6 = scmp.lt.u32.totalorder %s204_s2, %s284_s3 }
  0xfc   :  { %p210_p7 = pnand %p208_p6, %p205_p5 }
  0xfe   :  { %213 = shalt.err (!%p210_p7)
}
  0xff   :  { %138 = dma.vmem_to_hbm [thread:$0]  %s136_s6, 128, %s284_s3, [#allocation3]  }
 0x100   :  { %214 = dma.done.wait [#allocation3], 128  }
 0x101   :  { %215 = vsyncadd [#allocation3], 4294967168 }
 0x102   :  { %142 = vsyncpa [#allocation3], 1 }

</bundles_post_ra>
